<compile_context>
chip_gen: v5e
topology: v5e:2x2
jax: 0.10.0
libtpu: 0.0.40
codegen_flags: <defaults>
</compile_context>

<pallas_src>
import functools
import math

import jax
import jax.numpy as jnp
from jax import lax
from jax.experimental import pallas as pl
from jax.experimental.pallas import tpu as pltpu

_LANES = 128


def _sublane(dtype) -> int:
    # f32 vreg tile is (8, 128); sub-32-bit dtypes pack 2x along sublanes.
    return 16 if jnp.dtype(dtype).itemsize == 2 else 8


def _round_up(n, m):
    return ((n + m - 1) // m) * m


def _vmem_budget_bytes() -> int:
    """Generation-aware working-set budget: ~3/4 of physical VMEM."""
    cap = 64 * 1024 * 1024  # safe fallback (v7x physical VMEM)
    try:
        info = pltpu.get_tpu_info()
        cap = int(getattr(info, "vmem_capacity_bytes", cap)) or cap
    except Exception:
        pass
    return (cap * 3) // 4


def _pick_tile_rows(rows, row_bytes, requested, sub):
    """Largest row tile within the VMEM budget; never forces padding of `rows`."""
    budget = _vmem_budget_bytes()
    per_row = max(1, row_bytes) * 8  # in/out double-buffered + f32 temps (rough)
    cap = max(sub, (budget // per_row) // sub * sub)
    tile = max(sub, min(int(requested), cap))
    if tile >= rows:
        return rows          # single block; full-extent dim is always legal
    return tile              # multiple of `sub`; last grid block may be ragged


def _vmem_limit(tile_rows, row_bytes):
    budget = _vmem_budget_bytes()
    need = tile_rows * max(1, row_bytes) * 10 + (1 << 20)
    return int(min(budget, max(16 * 1024 * 1024, need)))


def _block_spec(shape, index_map, bufs=None):
    """BlockSpec with optional deeper pipelining; falls back if unsupported."""
    if bufs is not None:
        try:
            return pl.BlockSpec(shape, index_map, pipeline_mode=pl.Buffered(bufs))
        except TypeError:
            pass
    return pl.BlockSpec(shape, index_map)


# ----------------------------- LayerNorm (generic, lane-dense when d % 128 == 0)

def _layernorm_kernel(x_ref, alpha_ref, bias_ref, o_ref, *, eps, d_model):
    x = x_ref[...].astype(jnp.float32)                         # (T, d)
    mean = jnp.mean(x, axis=-1, keepdims=True)
    centered = x - mean
    # torch.std default: unbiased (Bessel-corrected, ddof=1).
    var = jnp.sum(centered * centered, axis=-1, keepdims=True) * (1.0 / (d_model - 1))
    inv = pl.reciprocal(jnp.sqrt(var) + eps, approx=False)     # EUP, not VALU divide
    alpha = alpha_ref[...].astype(jnp.float32)                 # (1, d)
    bias = bias_ref[...].astype(jnp.float32)                   # (1, d)
    o_ref[...] = (alpha * centered * inv + bias).astype(o_ref.dtype)


def _layernorm_generic(x2, alpha, bias, *, eps, tile_rows_req):
    rows, d = x2.shape
    sub = _sublane(x2.dtype)
    tile_rows = _pick_tile_rows(rows, d * 4, tile_rows_req, sub)
    grid = pl.cdiv(rows, tile_rows)                            # ragged last block OK
    kernel = functools.partial(_layernorm_kernel, eps=eps, d_model=d)
    return pl.pallas_call(
        kernel,
        out_shape=jax.ShapeDtypeStruct((rows, d), x2.dtype),
        grid_spec=pltpu.PrefetchScalarGridSpec(
            num_scalar_prefetch=0,
            grid=(grid,),
            in_specs=[
                pl.BlockSpec((tile_rows, d), lambda i: (i, 0)),
                pl.BlockSpec((1, d), lambda i: (0, 0)),
                pl.BlockSpec((1, d), lambda i: (0, 0)),
            ],
            out_specs=pl.BlockSpec((tile_rows, d), lambda i: (i, 0)),
        ),
        compiler_params=pltpu.CompilerParams(
            dimension_semantics=("parallel",),
            vmem_limit_bytes=_vmem_limit(tile_rows, d * 4),
        ),
    )(x2, alpha.reshape(1, d), bias.reshape(1, d))


# ------------------- LayerNorm (token-packed, lane-dense path for d_model < 128)

def _layernorm_packed_kernel(x_ref, alpha_ref, bias_ref, seg_ref, segt_ref, o_ref,
                             *, eps, d_model):
    # x block: (T, 128) -- each 128-lane row holds k = 128 // d_model tokens.
    x = x_ref[...].astype(jnp.float32)
    seg = seg_ref[...]                                         # (128, k) 0/1 segments
    segt = segt_ref[...]                                       # (k, 128) broadcast back
    hi = lax.Precision.HIGHEST
    # Segmented (per-token) sums via the MXU; scale in the small (T, k) domain.
    sums = jnp.dot(x, seg, preferred_element_type=jnp.float32, precision=hi)        # (T, k)
    mean_tk = sums * (1.0 / d_model)                                                 # (T, k)
    mean_b = jnp.dot(mean_tk, segt, preferred_element_type=jnp.float32, precision=hi)  # (T,128)
    centered = x - mean_b
    sqsum = jnp.dot(centered * centered, seg,
                    preferred_element_type=jnp.float32, precision=hi)                # (T, k)
    # Unbiased (ddof=1) std; reciprocal taken in the small (T, k) domain (EUP),
    # then broadcast back with the 0/1 matmul.
    inv_tk = pl.reciprocal(jnp.sqrt(sqsum * (1.0 / (d_model - 1))) + eps, approx=False)
    inv_b = jnp.dot(inv_tk, segt, preferred_element_type=jnp.float32, precision=hi)  # (T,128)
    alpha = alpha_ref[...].astype(jnp.float32)                 # (1, 128): alpha tiled k times
    bias = bias_ref[...].astype(jnp.float32)
    o_ref[...] = (alpha * centered * inv_b + bias).astype(o_ref.dtype)


def _layernorm_packed(x2, alpha, bias, *, eps, tile_rows_req):
    rows, d = x2.shape
    k = _LANES // d
    rows_k = _round_up(rows, k)                 # tiny pad (< k rows) only if needed
    if rows_k != rows:
        x2 = jnp.pad(x2, ((0, rows_k - rows), (0, 0)))
    packed_rows = rows_k // k
    xp = x2.reshape(packed_rows, _LANES)        # metadata-only reshape

    sub = _sublane(x2.dtype)
    tile_rows = _pick_tile_rows(packed_rows, _LANES * 4, tile_rows_req, sub)
    grid = pl.cdiv(packed_rows, tile_rows)

    alpha_p = jnp.tile(alpha.astype(jnp.float32).reshape(1, d), (1, k))   # (1, 128)
    bias_p = jnp.tile(bias.astype(jnp.float32).reshape(1, d), (1, k))
    lane = jnp.arange(_LANES, dtype=jnp.int32)
    seg = (lane[:, None] // d == jnp.arange(k, dtype=jnp.int32)[None, :]).astype(jnp.float32)
    segt = jnp.transpose(seg)

    kernel = functools.partial(_layernorm_packed_kernel, eps=eps, d_model=d)
    out = pl.pallas_call(
        kernel,
        out_shape=jax.ShapeDtypeStruct((packed_rows, _LANES), x2.dtype),
        grid_spec=pltpu.PrefetchScalarGridSpec(
            num_scalar_prefetch=0,
            grid=(grid,),
            in_specs=[
                pl.BlockSpec((tile_rows, _LANES), lambda i: (i, 0)),
                pl.BlockSpec((1, _LANES), lambda i: (0, 0)),
                pl.BlockSpec((1, _LANES), lambda i: (0, 0)),
                pl.BlockSpec((_LANES, k), lambda i: (0, 0)),
                pl.BlockSpec((k, _LANES), lambda i: (0, 0)),
            ],
            out_specs=pl.BlockSpec((tile_rows, _LANES), lambda i: (i, 0)),
        ),
        compiler_params=pltpu.CompilerParams(
            dimension_semantics=("parallel",),
            vmem_limit_bytes=_vmem_limit(tile_rows, _LANES * 4),
        ),
    )(xp, alpha_p, bias_p, seg, segt)
    res = out.reshape(rows_k, d)
    return res if rows_k == rows else res[:rows]


def pallas_layernorm(x, alpha, bias, *, eps=1e-6, tile_rows=512):
    """LayerNormalization.forward (torch semantics: ddof=1 std, eps on std)."""
    *lead, d = x.shape
    assert d >= 2, "Bessel-corrected (ddof=1) std needs d_model >= 2"
    rows = math.prod(lead) if lead else 1
    x2 = x.reshape(rows, d)
    if d < _LANES and _LANES % d == 0:
        try:
            out = _layernorm_packed(x2, alpha, bias, eps=eps, tile_rows_req=tile_rows)
        except Exception:
            # Safety net: fall back to the (correct, less lane-dense) generic path.
            out = _layernorm_generic(x2, alpha, bias, eps=eps, tile_rows_req=tile_rows)
    else:
        # TODO(synk): d_model that is neither a divisor nor a multiple of 128
        # (e.g. 96, 160) still takes this path with masked tail-lane stores.
        out = _layernorm_generic(x2, alpha, bias, eps=eps, tile_rows_req=tile_rows)
    return out.reshape(x.shape)


# ------------------------------------------------ residual add (lane-dense, tiled)

def _residual_add_kernel(x_ref, y_ref, o_ref):
    o_ref[...] = x_ref[...] + y_ref[...]


def _residual_add_call(xf, yf, tile, cols, bufs):
    rows = xf.shape[0]
    itemsize = jnp.dtype(xf.dtype).itemsize
    grid = pl.cdiv(rows, tile)
    in_spec = _block_spec((tile, cols), lambda i: (i, 0), bufs=bufs)
    return pl.pallas_call(
        _residual_add_kernel,
        out_shape=jax.ShapeDtypeStruct((rows, cols), xf.dtype),
        grid_spec=pltpu.PrefetchScalarGridSpec(
            num_scalar_prefetch=0,
            grid=(grid,),
            in_specs=[in_spec, in_spec],
            out_specs=pl.BlockSpec((tile, cols), lambda i: (i, 0)),
        ),
        compiler_params=pltpu.CompilerParams(
            dimension_semantics=("parallel",),
            vmem_limit_bytes=_vmem_limit(tile, cols * itemsize * 4),
        ),
    )(xf, yf)


def pallas_residual_add(x, y, *, tile_rows=1024):
    """out = x + y on zero-copy 2-D views (lane-dense when x.size % 128 == 0).

    NOTE: in a full model, letting XLA fuse the add into the sublayer's epilogue
    (plain `x + y`) saves one HBM round trip of `y`; the Pallas kernel is kept
    here because the add is the module's own forward op.
    """
    assert x.shape == y.shape and x.dtype == y.dtype
    total = x.size
    if total % _LANES == 0:
        rows, cols = total // _LANES, _LANES       # zero-copy lane-dense view
    else:
        cols = x.shape[-1] if x.ndim else 1
        rows = total // cols                       # natural 2-D view, no pad copy
    xf = x.reshape(rows, cols)
    yf = y.reshape(rows, cols)
    sub = _sublane(x.dtype)
    itemsize = jnp.dtype(x.dtype).itemsize
    tile = _pick_tile_rows(rows, cols * itemsize * 3, tile_rows, sub)
    try:
        out = _residual_add_call(xf, yf, tile, cols, bufs=3)
    except Exception:
        out = _residual_add_call(xf, yf, tile, cols, bufs=None)
    return out.reshape(x.shape)


# ---------------------------------------------------------- module forward + ref

def residual_connection_forward(x, params, sublayer, *, tile_rows=512):
    """ResidualConnection.forward: x + dropout(sublayer(norm(x))) (eval dropout)."""
    normed = pallas_layernorm(x, params["alpha"], params["bias"],
                              eps=params["eps"], tile_rows=tile_rows)
    sub_out = sublayer(normed)   # opaque sublayer callable (plain JAX)
    # TODO(synk): training-mode dropout mask not implemented (eval = identity).
    return pallas_residual_add(x, sub_out)


def _reference_forward(x, params, sublayer):
    x32 = x.astype(jnp.float32)
    mean = jnp.mean(x32, axis=-1, keepdims=True)
    std = jnp.std(x32, axis=-1, keepdims=True, ddof=1)   # torch unbiased std
    normed = (params["alpha"] * (x32 - mean) / (std + params["eps"])
              + params["bias"]).astype(x.dtype)
    return x + sublayer(normed)


if __name__ == "__main__":
    key = jax.random.PRNGKey(0)
    kx1, kx2, kx3, ka, kb, ka2, kb2 = jax.random.split(key, 7)

    def sublayer(t):
        # Stand-in for the opaque sublayer callable (attention / FFN block).
        return jnp.tanh(t)

    def check(x, params, atol=2e-5):
        out = jax.block_until_ready(residual_connection_forward(x, params, sublayer))
        ref = _reference_forward(x, params, sublayer)
        assert out.shape == x.shape and out.dtype == x.dtype
        err = float(jnp.max(jnp.abs(out - ref)))
        assert jnp.allclose(out, ref, atol=atol, rtol=atol), err

    # 1) module-scale shapes; d_model=32 < 128 exercises the token-packed,
    #    lane-dense LayerNorm path.
    d_model = 32
    x = jax.random.normal(kx1, (2, 8, d_model), dtype=jnp.float32)
    params = {"alpha": jax.random.normal(ka, (d_model,), dtype=jnp.float32),
              "bias": jax.random.normal(kb, (d_model,), dtype=jnp.float32),
              "eps": 1e-6}
    check(x, params)

    # 2) d_model multiple of 128: lane-dense generic path, single full block.
    d2 = 128
    x2 = jax.random.normal(kx2, (2, 8, d2), dtype=jnp.float32)
    params2 = {"alpha": jax.random.normal(ka2, (d2,), dtype=jnp.float32),
               "bias": jax.random.normal(kb2, (d2,), dtype=jnp.float32),
               "eps": 1e-6}
    check(x2, params2)

    # 3) multi-step grid with a ragged last block (rows not a tile multiple):
    #    exercises the pad-free cdiv tiling in both kernels.
    x3 = jax.random.normal(kx3, (4, 300, d2), dtype=jnp.float32)
    check(x3, params2)

    print("KERNEL_OK")
</pallas_src>

<mosaic_0001>
module attributes {stable_mosaic.version = 11 : i64} {
  func.func @_layernorm_packed_kernel(%arg0: i32, %arg1: memref<4x128xf32, #tpu.memory_space<vmem>>, %arg2: memref<1x128xf32, #tpu.memory_space<vmem>>, %arg3: memref<1x128xf32, #tpu.memory_space<vmem>>, %arg4: memref<128x4xf32, #tpu.memory_space<vmem>>, %arg5: memref<4x128xf32, #tpu.memory_space<vmem>>, %arg6: memref<4x128xf32, #tpu.memory_space<vmem>>) attributes {dimension_semantics = [#tpu.dimension_semantics<parallel>], iteration_bounds = array<i64: 1>, scalar_prefetch = 0 : i64, scratch_operands = 0 : i64, tpu.core_type = #tpu.core_type<tc>, window_params = [{transform_indices = @transform_0, window_bounds = array<i64: 4, 128>}, {pipeline_mode = #tpu.pipeline_mode<synchronous>, transform_indices = @transform_1, window_bounds = array<i64: 1, 128>}, {pipeline_mode = #tpu.pipeline_mode<synchronous>, transform_indices = @transform_2, window_bounds = array<i64: 1, 128>}, {pipeline_mode = #tpu.pipeline_mode<synchronous>, transform_indices = @transform_3, window_bounds = array<i64: 128, 4>}, {pipeline_mode = #tpu.pipeline_mode<synchronous>, transform_indices = @transform_4, window_bounds = array<i64: 4, 128>}, {transform_indices = @transform_5, window_bounds = array<i64: 4, 128>}]} {
    %c0 = arith.constant 0 : index
    %c0_0 = arith.constant 0 : index
    %0 = vector.load %arg1[%c0, %c0_0] : memref<4x128xf32, #tpu.memory_space<vmem>>, vector<4x128xf32>
    %c0_1 = arith.constant 0 : index
    %c0_2 = arith.constant 0 : index
    %1 = vector.load %arg4[%c0_1, %c0_2] : memref<128x4xf32, #tpu.memory_space<vmem>>, vector<128x4xf32>
    %c0_3 = arith.constant 0 : index
    %c0_4 = arith.constant 0 : index
    %2 = vector.load %arg5[%c0_3, %c0_4] : memref<4x128xf32, #tpu.memory_space<vmem>>, vector<4x128xf32>
    %cst = arith.constant dense<0.000000e+00> : vector<4x4xf32>
    %3 = tpu.matmul %0, %1, %cst {dimension_numbers = #tpu.dot_dimension_numbers<[1], [0], [0], [1], [0, 0, 1, 1], [], []>, precision = #tpu.contract_precision<fp32>} : vector<4x128xf32>, vector<128x4xf32>, vector<4x4xf32> -> vector<4x4xf32>
    %cst_5 = arith.constant 3.125000e-02 : f32
    %4 = vector.broadcast %cst_5 : f32 to vector<4x4xf32>
    %5 = arith.mulf %3, %4 : vector<4x4xf32>
    %cst_6 = arith.constant dense<0.000000e+00> : vector<4x128xf32>
    %6 = tpu.matmul %5, %2, %cst_6 {dimension_numbers = #tpu.dot_dimension_numbers<[1], [0], [0], [1], [0, 0, 1, 1], [], []>, precision = #tpu.contract_precision<fp32>} : vector<4x4xf32>, vector<4x128xf32>, vector<4x128xf32> -> vector<4x128xf32>
    %7 = arith.subf %0, %6 : vector<4x128xf32>
    %8 = arith.mulf %7, %7 : vector<4x128xf32>
    %cst_7 = arith.constant dense<0.000000e+00> : vector<4x4xf32>
    %9 = tpu.matmul %8, %1, %cst_7 {dimension_numbers = #tpu.dot_dimension_numbers<[1], [0], [0], [1], [0, 0, 1, 1], [], []>, precision = #tpu.contract_precision<fp32>} : vector<4x128xf32>, vector<128x4xf32>, vector<4x4xf32> -> vector<4x4xf32>
    %cst_8 = arith.constant 0.0322580636 : f32
    %10 = vector.broadcast %cst_8 : f32 to vector<4x4xf32>
    %11 = arith.mulf %9, %10 : vector<4x4xf32>
    %12 = math.sqrt %11 : vector<4x4xf32>
    %cst_9 = arith.constant 9.99999997E-7 : f32
    %13 = vector.broadcast %cst_9 : f32 to vector<4x4xf32>
    %14 = arith.addf %12, %13 : vector<4x4xf32>
    %15 = tpu.reciprocal %14 : vector<4x4xf32> -> vector<4x4xf32>
    %cst_10 = arith.constant dense<0.000000e+00> : vector<4x128xf32>
    %16 = tpu.matmul %15, %2, %cst_10 {dimension_numbers = #tpu.dot_dimension_numbers<[1], [0], [0], [1], [0, 0, 1, 1], [], []>, precision = #tpu.contract_precision<fp32>} : vector<4x4xf32>, vector<4x128xf32>, vector<4x128xf32> -> vector<4x128xf32>
    %c0_11 = arith.constant 0 : index
    %c0_12 = arith.constant 0 : index
    %17 = vector.load %arg2[%c0_11, %c0_12] : memref<1x128xf32, #tpu.memory_space<vmem>>, vector<1x128xf32>
    %c0_13 = arith.constant 0 : index
    %c0_14 = arith.constant 0 : index
    %18 = vector.load %arg3[%c0_13, %c0_14] : memref<1x128xf32, #tpu.memory_space<vmem>>, vector<1x128xf32>
    %19 = vector.broadcast %17 : vector<1x128xf32> to vector<4x128xf32>
    %20 = arith.mulf %19, %7 : vector<4x128xf32>
    %21 = arith.mulf %20, %16 : vector<4x128xf32>
    %22 = vector.broadcast %18 : vector<1x128xf32> to vector<4x128xf32>
    %23 = arith.addf %21, %22 : vector<4x128xf32>
    %c0_15 = arith.constant 0 : index
    %c0_16 = arith.constant 0 : index
    %24 = vector.load %arg6[%c0_15, %c0_16] : memref<4x128xf32, #tpu.memory_space<vmem>>, vector<4x128xf32>
    tpu.vector_store %arg6[%c0_15, %c0_16], %23 {strides = array<i32>} : memref<4x128xf32, #tpu.memory_space<vmem>>, vector<4x128xf32>,
    return
  }
  func.func @transform_0(%arg0: i32) -> (i32, i32) {
    %c0_i32 = arith.constant 0 : i32
    %c0_i32_0 = arith.constant 0 : i32
    return %arg0, %c0_i32 : i32, i32
  }
  func.func @transform_1(%arg0: i32) -> (i32, i32) {
    %c0_i32 = arith.constant 0 : i32
    %c0_i32_0 = arith.constant 0 : i32
    %c0_i32_1 = arith.constant 0 : i32
    return %c0_i32, %c0_i32_0 : i32, i32
  }
  func.func @transform_2(%arg0: i32) -> (i32, i32) {
    %c0_i32 = arith.constant 0 : i32
    %c0_i32_0 = arith.constant 0 : i32
    %c0_i32_1 = arith.constant 0 : i32
    return %c0_i32, %c0_i32_0 : i32, i32
  }
  func.func @transform_3(%arg0: i32) -> (i32, i32) {
    %c0_i32 = arith.constant 0 : i32
    %c0_i32_0 = arith.constant 0 : i32
    %c0_i32_1 = arith.constant 0 : i32
    return %c0_i32, %c0_i32_0 : i32, i32
  }
  func.func @transform_4(%arg0: i32) -> (i32, i32) {
    %c0_i32 = arith.constant 0 : i32
    %c0_i32_0 = arith.constant 0 : i32
    %c0_i32_1 = arith.constant 0 : i32
    return %c0_i32, %c0_i32_0 : i32, i32
  }
  func.func @transform_5(%arg0: i32) -> (i32, i32) {
    %c0_i32 = arith.constant 0 : i32
    %c0_i32_0 = arith.constant 0 : i32
    return %arg0, %c0_i32 : i32, i32
  }
}

module attributes {stable_mosaic.version = 11 : i64} {
  func.func @_layernorm_kernel(%arg0: i32, %arg1: memref<16x32xf32, #tpu.memory_space<vmem>>, %arg2: memref<1x32xf32, #tpu.memory_space<vmem>>, %arg3: memref<1x32xf32, #tpu.memory_space<vmem>>, %arg4: memref<16x32xf32, #tpu.memory_space<vmem>>) attributes {dimension_semantics = [#tpu.dimension_semantics<parallel>], iteration_bounds = array<i64: 1>, scalar_prefetch = 0 : i64, scratch_operands = 0 : i64, tpu.core_type = #tpu.core_type<tc>, window_params = [{transform_indices = @transform_0, window_bounds = array<i64: 16, 32>}, {pipeline_mode = #tpu.pipeline_mode<synchronous>, transform_indices = @transform_1, window_bounds = array<i64: 1, 32>}, {pipeline_mode = #tpu.pipeline_mode<synchronous>, transform_indices = @transform_2, window_bounds = array<i64: 1, 32>}, {transform_indices = @transform_3, window_bounds = array<i64: 16, 32>}]} {
    %c0 = arith.constant 0 : index
    %c0_0 = arith.constant 0 : index
    %0 = vector.load %arg1[%c0, %c0_0] : memref<16x32xf32, #tpu.memory_space<vmem>>, vector<16x32xf32>
    %cst = arith.constant dense<0.000000e+00> : vector<16xf32>
    %1 = vector.multi_reduction <add>, %0, %cst [1] : vector<16x32xf32> to vector<16xf32>
    %2 = vector.shape_cast %1 : vector<16xf32> to vector<16x1xf32>
    %cst_1 = arith.constant 3.200000e+01 : f32
    %3 = vector.broadcast %cst_1 : f32 to vector<16x1xf32>
    %4 = arith.divf %2, %3 : vector<16x1xf32>
    %5 = vector.broadcast %4 : vector<16x1xf32> to vector<16x32xf32>
    %6 = arith.subf %0, %5 : vector<16x32xf32>
    %7 = arith.mulf %6, %6 : vector<16x32xf32>
    %cst_2 = arith.constant dense<0.000000e+00> : vector<16xf32>
    %8 = vector.multi_reduction <add>, %7, %cst_2 [1] : vector<16x32xf32> to vector<16xf32>
    %9 = vector.shape_cast %8 : vector<16xf32> to vector<16x1xf32>
    %cst_3 = arith.constant 0.0322580636 : f32
    %10 = vector.broadcast %cst_3 : f32 to vector<16x1xf32>
    %11 = arith.mulf %9, %10 : vector<16x1xf32>
    %12 = math.sqrt %11 : vector<16x1xf32>
    %cst_4 = arith.constant 9.99999997E-7 : f32
    %13 = vector.broadcast %cst_4 : f32 to vector<16x1xf32>
    %14 = arith.addf %12, %13 : vector<16x1xf32>
    %15 = tpu.reciprocal %14 : vector<16x1xf32> -> vector<16x1xf32>
    %c0_5 = arith.constant 0 : index
    %c0_6 = arith.constant 0 : index
    %16 = vector.load %arg2[%c0_5, %c0_6] : memref<1x32xf32, #tpu.memory_space<vmem>>, vector<1x32xf32>
    %c0_7 = arith.constant 0 : index
    %c0_8 = arith.constant 0 : index
    %17 = vector.load %arg3[%c0_7, %c0_8] : memref<1x32xf32, #tpu.memory_space<vmem>>, vector<1x32xf32>
    %18 = vector.broadcast %16 : vector<1x32xf32> to vector<16x32xf32>
    %19 = arith.mulf %18, %6 : vector<16x32xf32>
    %20 = vector.broadcast %15 : vector<16x1xf32> to vector<16x32xf32>
    %21 = arith.mulf %19, %20 : vector<16x32xf32>
    %22 = vector.broadcast %17 : vector<1x32xf32> to vector<16x32xf32>
    %23 = arith.addf %21, %22 : vector<16x32xf32>
    %c0_9 = arith.constant 0 : index
    %c0_10 = arith.constant 0 : index
    %24 = vector.load %arg4[%c0_9, %c0_10] : memref<16x32xf32, #tpu.memory_space<vmem>>, vector<16x32xf32>
    tpu.vector_store %arg4[%c0_9, %c0_10], %23 {strides = array<i32>} : memref<16x32xf32, #tpu.memory_space<vmem>>, vector<16x32xf32>,
    return
  }
  func.func @transform_0(%arg0: i32) -> (i32, i32) {
    %c0_i32 = arith.constant 0 : i32
    %c0_i32_0 = arith.constant 0 : i32
    return %arg0, %c0_i32 : i32, i32
  }
  func.func @transform_1(%arg0: i32) -> (i32, i32) {
    %c0_i32 = arith.constant 0 : i32
    %c0_i32_0 = arith.constant 0 : i32
    %c0_i32_1 = arith.constant 0 : i32
    return %c0_i32, %c0_i32_0 : i32, i32
  }
  func.func @transform_2(%arg0: i32) -> (i32, i32) {
    %c0_i32 = arith.constant 0 : i32
    %c0_i32_0 = arith.constant 0 : i32
    %c0_i32_1 = arith.constant 0 : i32
    return %c0_i32, %c0_i32_0 : i32, i32
  }
  func.func @transform_3(%arg0: i32) -> (i32, i32) {
    %c0_i32 = arith.constant 0 : i32
    %c0_i32_0 = arith.constant 0 : i32
    return %arg0, %c0_i32 : i32, i32
  }
}

</mosaic_0001>

<bundles_post_ra>
// kernel: tpu_custom_call.1
= control target key start
LH: loop header
LB: loop body
LE: loop exit
PB: predicated region body
PF: predicated region fallthrough
CT: control target
= control target key end

     0   :  { %s1632_s0 = inlined_call_operand.vmem [shape: f32[4,128], index: 0, kind: input, shape index: {}]   ;;  %s1633_s1 = inlined_call_operand.vmem [shape: f32[1,128], index: 1, kind: input, shape index: {}]   ;;  %s1634_s2 = inlined_call_operand.vmem [shape: f32[1,128], index: 2, kind: input, shape index: {}]   ;;  %s1635_s3 = inlined_call_operand.vmem [shape: f32[128,4], index: 3, kind: input, shape index: {}]   ;;  %s1636_s4 = inlined_call_operand.vmem [shape: f32[4,128], index: 4, kind: input, shape index: {}]   ;;  %s1637_s5 = inlined_call_operand.hbm [shape: f32[4,128], index: 5, kind: output, shape index: {}]  }
   0x1   :  { %v37_v0 = vld [vmem:[%s1635_s3 + $0x78] sm:$0xff]  ;;  %v36_v1 = vld [vmem:[%s1635_s3 + $0x70] sm:$0xff]  ;;  %v35_v2 = vld [vmem:[%s1635_s3 + $0x68] sm:$0xff] }
   0x2   :  { %v1156_v3 = vand.u32 4294901760, %v37_v0  ;;  %v1158_v4 = vand.u32 4294901760, %v36_v1  ;;  %v1160_v5 = vand.u32 4294901760, %v35_v2  ;;  %v34_v6 = vld [vmem:[%s1635_s3 + $0x60] sm:$0xff]  ;;  %v33_v7 = vld [vmem:[%s1635_s3 + $0x58] sm:$0xff]  ;;  %v32_v8 = vld [vmem:[%s1635_s3 + $0x50] sm:$0xff] }
   0x3   :  { %v1171_v9 = vand.u32 4294901760, %v34_v6  ;;  %v1173_v10 = vand.u32 4294901760, %v33_v7  ;;  %v1175_v11 = vand.u32 4294901760, %v32_v8  ;;  %v31_v12 = vld [vmem:[%s1635_s3 + $0x48] sm:$0xff]  ;;  %v30_v13 = vld [vmem:[%s1635_s3 + $0x40] sm:$0xff]  ;;  %v29_v18 = vld [vmem:[%s1635_s3 + $0x38] sm:$0xff] }
   0x4   :  { %40 = vmatpush.msra.mxu0 %v1156_v3  ;;  %v1185_v14 = vsub.f32 %v37_v0, %v1156_v3  ;;  %v1188_v15 = vsub.f32 %v36_v1, %v1158_v4  ;;  %v1191_v16 = vsub.f32 %v35_v2, %v1160_v5  ;;  %v1193_v17 = vand.u32 4294901760, %v31_v12  ;;  %236 = vmatpush.msra.mxu3 %v1156_v3  ;;  %v28_v26 = vld [vmem:[%s1635_s3 + $0x30] sm:$0xff] }
   0x5   :  { %v1200_v19 = vsub.f32 %v34_v6, %v1171_v9  ;;  %v1203_v20 = vsub.f32 %v33_v7, %v1173_v10  ;;  %v1206_v21 = vsub.f32 %v32_v8, %v1175_v11  ;;  %v1218_v25 = vand.u32 4294901760, %v30_v13 }
   0x6   :  { %42 = vmatpush.msra.mxu0 %v1158_v4  ;;  %v1210_v22 = vand.u32 4294901760, %v1185_v14  ;;  %v1213_v23 = vand.u32 4294901760, %v1188_v15  ;;  %v1216_v24 = vand.u32 4294901760, %v1191_v16  ;;  %183 = vmatpush.msra.mxu2 %v1185_v14  ;;  %v1227_v28 = vand.u32 4294901760, %v29_v18 }
   0x7   :  { %v1225_v27 = vand.u32 4294901760, %v1200_v19  ;;  %v1230_v29 = vsub.f32 %v31_v12, %v1193_v17  ;;  %238 = vmatpush.msra.mxu3 %v1158_v4  ;;  %v1241_v33 = vand.u32 4294901760, %v1203_v20 }
   0x8   :  { %44 = vmatpush.msra.mxu0 %v1160_v5  ;;  %v83_v30 = vsub.f32 %v1185_v14, %v1210_v22  ;;  %v89_v31 = vsub.f32 %v1188_v15, %v1213_v23  ;;  %v95_v32 = vsub.f32 %v1191_v16, %v1216_v24  ;;  %186 = vmatpush.msra.mxu2 %v1188_v15 }
   0x9   :  { %10 = vsyncpa [#allocation3], 0  ;;  %v1245_v34 = vand.u32 4294901760, %v1206_v21  ;;  %v1247_v35 = vand.u32 4294901760, %v28_v26  ;;  %v27_v36 = vld [vmem:[%s1635_s3 + $0x28] sm:$0xff]  ;;  %240 = vmatpush.msra.mxu3 %v1160_v5  ;;  %v101_v39 = vsub.f32 %v1200_v19, %v1225_v27  ;;  %v1261_v40 = vsub.f32 %v30_v13, %v1218_v25  ;;  %v26_v42 = vld [vmem:[%s1635_s3 + $0x20] sm:$0xff] }
   0xa   :  { %v1253_v37 = vand.u32 4294901760, %v83_v30  ;;  %46 = vmatpush.msra.mxu0 %v1171_v9  ;;  %v1256_v38 = vand.u32 4294901760, %v89_v31  ;;  %189 = vmatpush.msra.mxu2 %v1191_v16  ;;  %v1265_v41 = vand.u32 4294901760, %v1230_v29  ;;  %v1273_v43 = vand.u32 4294901760, %v95_v32  ;;  %v25_v47 = vld [vmem:[%s1635_s3 + $0x18] sm:$0xff]  ;;  %v24_v55 = vld [vmem:[%s1635_s3 + $0x10] sm:$0xff] }
   0xb   :  { %242 = vmatpush.msra.mxu3 %v1171_v9  ;;  %v107_v44 = vsub.f32 %v1203_v20, %v1241_v33  ;;  %v1277_v45 = vand.u32 4294901760, %v27_v36  ;;  %v1280_v46 = vsub.f32 %v29_v18, %v1227_v28  ;;  %v113_v48 = vsub.f32 %v1206_v21, %v1245_v34  ;;  %v23_v60 = vld [vmem:[%s1635_s3 + $0x8] sm:$0xff]  ;;  %v22_v1 = vld [vmem:[%s1635_s3] sm:$0xff]  ;;  %s1116_s30 = smov [#allocation2]   ;;  %s1074_s9 = sshll.u32 %s1637_s5, 4  ;;  %s1075_s9 = int_to_ptr.hbm [resolvable:$true] %s1074_s9 }
   0xc   :  { %85 = vmatpush.msra.mxu1 %v1253_v37  ;;  %48 = vmatpush.msra.mxu0 %v1173_v10  ;;  %v1291_v49 = vand.u32 4294901760, %v101_v39  ;;  %v1294_v50 = vand.u32 4294901760, %v1261_v40  ;;  %v1296_v51 = vand.u32 4294901760, %v26_v42  ;;  %v1299_v52 = vsub.f32 %v28_v26, %v1247_v35  ;;  %v1352_v7 = vld [vmem:[%s1632_s0] sm:$0xf]  ;;  %s1072_s6 = sshll.u32 %s1116_s30, 4  ;;  %s1073_s6 = int_to_ptr.vmem [resolvable:$true] %s1072_s6 }
   0xd   :  { %192 = vmatpush.msra.mxu2 %v1200_v19  ;;  %244 = vmatpush.msra.mxu3 %v1173_v10  ;;  %v119_v53 = vsub.f32 %v1230_v29, %v1265_v41  ;;  %v1303_v54 = vand.u32 4294901760, %v25_v47  ;;  %v1312_v56 = vand.u32 4294901760, %v107_v44  ;;  %v1315_v57 = vand.u32 4294901760, %v1280_v46  ;;  %1649 = vst [vmem:[#allocation8_spill] sm:$0xff] %v1352_v7 }
   0xe   :  { %91 = vmatpush.msra.mxu1 %v1256_v38  ;;  %50 = vmatpush.msra.mxu0 %v1175_v11  ;;  %v1318_v58 = vsub.f32 %v27_v36, %v1277_v45  ;;  %v1320_v59 = vand.u32 4294901760, %v113_v48  ;;  %v125_v61 = vsub.f32 %v1261_v40, %v1294_v50  ;;  %v1332_v62 = vand.u32 4294901760, %v1299_v52 }
   0xf   :  { %195 = vmatpush.msra.mxu2 %v1203_v20  ;;  %246 = vmatpush.msra.mxu3 %v1175_v11  ;;  %1646 = vst [vmem:[#allocation5_spill] sm:$0xff] %v1312_v56  ;;  %v1334_v63 = vand.u32 4294901760, %v24_v55  ;;  %v1337_v0 = vsub.f32 %v26_v42, %v1296_v51  ;;  %v1342_v2 = vand.u32 4294901760, %v119_v53  ;;  %v1345_v6 = vsub.f32 %v25_v47, %v1303_v54 }
  0x10   :  { %97 = vmatpush.msra.mxu1 %v1273_v43  ;;  %52 = vmatpush.msra.mxu0 %v1193_v17  ;;  %1647 = vst [vmem:[#allocation6_spill] sm:$0xff] %v1320_v59  ;;  %v131_v8 = vsub.f32 %v1280_v46, %v1315_v57  ;;  %v1359_v12 = vand.u32 4294901760, %v1318_v58  ;;  %v1361_v13 = vand.u32 4294901760, %v23_v60  ;;  %v1364_v18 = vand.u32 4294901760, %v1352_v7 }
  0x11   :  { %198 = vmatpush.msra.mxu2 %v1206_v21  ;;  %248 = vmatpush.msra.mxu3 %v1193_v17  ;;  %1648 = vst [vmem:[#allocation7_spill] sm:$0xff] %v1342_v2  ;;  %v1366_v26 = vand.u32 4294901760, %v22_v1  ;;  %v1372_v30 = vand.u32 4294901760, %v125_v61  ;;  %v137_v31 = vsub.f32 %v1299_v52, %v1332_v62  ;;  %v1377_v32 = vand.u32 4294901760, %v1337_v0 }
  0x12   :  { %103 = vmatpush.msra.mxu1 %v1291_v49  ;;  %54 = vmatpush.msra.mxu0 %v1218_v25  ;;  %v1380_v36 = vsub.f32 %v24_v55, %v1334_v63  ;;  %v1383_v39 = vand.u32 4294901760, %v1345_v6  ;;  %v1389_v42 = vand.u32 4294901760, %v131_v8  ;;  %v143_v44 = vsub.f32 %v1318_v58, %v1359_v12 }
  0x13   :  { %201 = vmatpush.msra.mxu2 %v1230_v29  ;;  %250 = vmatpush.msra.mxu3 %v1218_v25  ;;  %1650 = vst [vmem:[#allocation9_spill] sm:$0xff] %v1372_v30  ;;  %v1394_v47 = vsub.f32 %v23_v60, %v1361_v13  ;;  %v72_v48 = vsub.f32 %v1352_v7, %v1364_v18  ;;  %v1402_v53 = vand.u32 4294901760, %v137_v31  ;;  %vm385_vm0 = vcmask 1043456  }
  0x14   :  { %109 = vmatpush.msra.mxu1 %v1312_v56  ;;  %56 = vmatpush.msra.mxu0 %v1227_v28  ;;  %1651 = vst [vmem:[#allocation10_spill] sm:$0xff] %v1389_v42  ;;  %v149_v55 = vsub.f32 %v1337_v0, %v1377_v32  ;;  %v1407_v61 = vand.u32 4294901760, %v1380_v36  ;;  %v1410_v60 = vsub.f32 %v22_v1, %v1366_v26  ;;  %v1416_v8 = vand.u32 4294901760, %v143_v44 }
  0x15   :  { %204 = vmatpush.msra.mxu2 %v1261_v40  ;;  %252 = vmatpush.msra.mxu3 %v1227_v28  ;;  %1652 = vst [vmem:[#allocation11_spill] sm:$0xff] %v1402_v53  ;;  %v155_v31 = vsub.f32 %v1345_v6, %v1383_v39  ;;  %v1421_v7 = vand.u32 4294901760, %v1394_v47  ;;  %vm381_vm1 = vcmask 31744  }
  0x16   :  { %115 = vmatpush.msra.mxu1 %v1320_v59  ;;  %58 = vmatpush.msra.mxu0 %v1247_v35  ;;  %1653 = vst [vmem:[#allocation12_spill] sm:$0xff] %v1416_v8  ;;  %v1427_v1 = vand.u32 4294901760, %v149_v55  ;;  %v161_v44 = vsub.f32 %v1380_v36, %v1407_v61 }
  0x17   :  { %207 = vmatpush.msra.mxu2 %v1280_v46  ;;  %254 = vmatpush.msra.mxu3 %v1247_v35  ;;  %v167_v55 = vsub.f32 %v1394_v47, %v1421_v7 }
  0x18   :  { %121 = vmatpush.msra.mxu1 %v1342_v2  ;;  %60 = vmatpush.msra.mxu0 %v1277_v45  ;;  %v1438_v2 = vand.u32 4294901760, %v155_v31  ;;  %v1446_v59 = vand.u32 4294901760, %v161_v44 }
  0x19   :  { %210 = vmatpush.msra.mxu2 %v1299_v52  ;;  %256 = vmatpush.msra.mxu3 %v1277_v45  ;;  %v1453_v31 = vand.u32 4294901760, %v167_v55 }
  0x1a   :  { %127 = vmatpush.msra.mxu1 %v1372_v30  ;;  %62 = vmatpush.msra.mxu0 %v1296_v51  ;;  %v73_v30 = vand.u32 4294901760, %v72_v48 }
  0x1b   :  { %213 = vmatpush.msra.mxu2 %v1318_v58  ;;  %258 = vmatpush.msra.mxu3 %v1296_v51 }
  0x1c   :  { %133 = vmatpush.msra.mxu1 %v1389_v42  ;;  %64 = vmatpush.msra.mxu0 %v1303_v54  ;;  %v1432_v42 = vand.u32 4294901760, %v1410_v60 }
  0x1d   :  { %216 = vmatpush.msra.mxu2 %v1337_v0  ;;  %260 = vmatpush.msra.mxu3 %v1303_v54 }
  0x1e   :  { %139 = vmatpush.msra.mxu1 %v1402_v53  ;;  %66 = vmatpush.msra.mxu0 %v1334_v63  ;;  %v74_v53 = vsub.f32 %v72_v48, %v73_v30 }
  0x1f   :  { %219 = vmatpush.msra.mxu2 %v1345_v6  ;;  %262 = vmatpush.msra.mxu3 %v1334_v63 }
  0x20   :  { %145 = vmatpush.msra.mxu1 %v1416_v8  ;;  %68 = vmatpush.msra.mxu0 %v1361_v13  ;;  %v173_v8 = vsub.f32 %v1410_v60, %v1432_v42  ;;  %v75_v56 = vand.u32 4294901760, %v74_v53 }
  0x21   :  { %222 = vmatpush.msra.mxu2 %v1380_v36  ;;  %264 = vmatpush.msra.mxu3 %v1361_v13 }
  0x22   :  { %151 = vmatpush.msra.mxu1 %v1427_v1  ;;  %70 = vmatpush.msra.mxu0 %v1366_v26  ;;  %v1459_v44 = vand.u32 4294901760, %v173_v8 }
  0x23   :  { %225 = vmatpush.msra.mxu2 %v1394_v47  ;;  %266 = vmatpush.msra.mxu3 %v1366_v26 }
  0x24   :  { %277 = vmatpush.msrb.mxu0 %v1210_v22  ;;  %157 = vmatpush.msra.mxu1 %v1438_v2 }
  0x25   :  { %228 = vmatpush.msra.mxu2 %v1410_v60  ;;  %270 = vmatmul.f32.vlgmr.msra.gmra.mxu3 %v73_v30 }
  0x26   :  { %281 = vmatpush.msrb.mxu0 %v1213_v23  ;;  %163 = vmatpush.msra.mxu1 %v1446_v59 }
  0x27   :  { %231 = vmatmul.f32.vlgmr.msra.gmra.mxu2 %v72_v48  ;;  %76 = vmatmul.f32.vlgmr.msra.gmra.mxu0 %v75_v56 }
  0x28   :  { %285 = vmatpush.msrb.mxu0 %v1216_v24  ;;  %169 = vmatpush.msra.mxu1 %v1453_v31 }
  0x2a   :  { %289 = vmatpush.msrb.mxu0 %v1225_v27  ;;  %175 = vmatpush.msra.mxu1 %v1459_v44 }
  0x2b   :  { %177 = vmatmul.f32.vlgmr.msra.gmra.mxu1 %v1364_v18 }
  0x2c   :  { %344 = vmatpush.msrb.mxu1 %v1156_v3  ;;  %293 = vmatpush.msrb.mxu0 %v1241_v33 }
  0x2e   :  { %346 = vmatpush.msrb.mxu1 %v1158_v4  ;;  %297 = vmatpush.msrb.mxu0 %v1245_v34 }
  0x30   :  { %348 = vmatpush.msrb.mxu1 %v1160_v5  ;;  %301 = vmatpush.msrb.mxu0 %v1265_v41 }
  0x32   :  { %350 = vmatpush.msrb.mxu1 %v1171_v9  ;;  %305 = vmatpush.msrb.mxu0 %v1294_v50 }
  0x34   :  { %352 = vmatpush.msrb.mxu1 %v1173_v10  ;;  %309 = vmatpush.msrb.mxu0 %v1315_v57 }
  0x36   :  { %354 = vmatpush.msrb.mxu1 %v1175_v11  ;;  %313 = vmatpush.msrb.mxu0 %v1332_v62 }
  0x38   :  { %356 = vmatpush.msrb.mxu1 %v1193_v17  ;;  %317 = vmatpush.msrb.mxu0 %v1359_v12 }
  0x3a   :  { %358 = vmatpush.msrb.mxu1 %v1218_v25  ;;  %321 = vmatpush.msrb.mxu0 %v1377_v32 }
  0x3c   :  { %360 = vmatpush.msrb.mxu1 %v1227_v28  ;;  %325 = vmatpush.msrb.mxu0 %v1383_v39 }
  0x3e   :  { %362 = vmatpush.msrb.mxu1 %v1247_v35  ;;  %329 = vmatpush.msrb.mxu0 %v1407_v61 }
  0x40   :  { %364 = vmatpush.msrb.mxu1 %v1277_v45  ;;  %333 = vmatpush.msrb.mxu0 %v1421_v7 }
  0x42   :  { %366 = vmatpush.msrb.mxu1 %v1296_v51  ;;  %337 = vmatpush.msrb.mxu0 %v1432_v42 }
  0x43   :  { %339 = vmatmul.f32.vlgmr.msrb.gmra.mxu0 %v1364_v18 }
  0x44   :  { %368 = vmatpush.msrb.mxu1 %v1303_v54  ;;  %681 = vmatpush.msra.mxu0 %v1185_v14  ;;  %v38_v14 = vld [vmem:[%s1636_s4] sm:$0xf] }
  0x46   :  { %370 = vmatpush.msrb.mxu1 %v1334_v63  ;;  %684 = vmatpush.msra.mxu0 %v1188_v15  ;;  %v387_v15 = vsel %vm385_vm0, %v38_v14, 0 }
  0x48   :  { %372 = vmatpush.msrb.mxu1 %v1361_v13  ;;  %687 = vmatpush.msra.mxu0 %v1191_v16  ;;  %v1531_v16 = vand.u32 4294901760, %v387_v15 }
  0x4a   :  { %374 = vmatpush.msrb.mxu1 %v1366_v26  ;;  %690 = vmatpush.msra.mxu0 %v1200_v19  ;;  %v1534_v19 = vsub.f32 %v387_v15, %v1531_v16 }
  0x4b   :  { %376 = vmatmul.f32.vlgmr.msrb.gmra.mxu1 %v1364_v18  ;;  %405 = vmatpush.msrb.mxu2 %v1531_v16 }
  0x4c   :  { %734 = vmatpush.msra.mxu1 %v1156_v3  ;;  %693 = vmatpush.msra.mxu0 %v1203_v20  ;;  %v1539_v20 = vand.u32 4294901760, %v1534_v19 }
  0x4d   :  { %458 = vmatpush.msra.mxu2 %v1534_v19 }
  0x4e   :  { %736 = vmatpush.msra.mxu1 %v1158_v4  ;;  %696 = vmatpush.msra.mxu0 %v1206_v21  ;;  %v433_v21 = vsub.f32 %v1534_v19, %v1539_v20 }
  0x50   :  { %738 = vmatpush.msra.mxu1 %v1160_v5  ;;  %699 = vmatpush.msra.mxu0 %v1230_v29  ;;  %v434_v29 = vand.u32 4294901760, %v433_v21  ;;  %v1654_v21 = vld [vmem:[#allocation5_spill] sm:$0xff] }
  0x52   :  { %740 = vmatpush.msra.mxu1 %v1171_v9  ;;  %702 = vmatpush.msra.mxu0 %v1261_v40 }
  0x53   :  { %435 = vmatpush.msrb.mxu3 %v434_v29 }
  0x54   :  { %742 = vmatpush.msra.mxu1 %v1173_v10  ;;  %705 = vmatpush.msra.mxu0 %v1280_v46 }
  0x55   :  { %481 = vmatpush.msra.mxu3 %v1531_v16 }
  0x56   :  { %744 = vmatpush.msra.mxu1 %v1175_v11  ;;  %708 = vmatpush.msra.mxu0 %v1299_v52 }
  0x58   :  { %746 = vmatpush.msra.mxu1 %v1193_v17  ;;  %711 = vmatpush.msra.mxu0 %v1318_v58 }
  0x5a   :  { %748 = vmatpush.msra.mxu1 %v1218_v25  ;;  %714 = vmatpush.msra.mxu0 %v1337_v0 }
  0x5c   :  { %750 = vmatpush.msra.mxu1 %v1227_v28  ;;  %717 = vmatpush.msra.mxu0 %v1345_v6 }
  0x5e   :  { %752 = vmatpush.msra.mxu1 %v1247_v35  ;;  %720 = vmatpush.msra.mxu0 %v1380_v36 }
  0x60   :  { %754 = vmatpush.msra.mxu1 %v1277_v45  ;;  %723 = vmatpush.msra.mxu0 %v1394_v47 }
  0x62   :  { %756 = vmatpush.msra.mxu1 %v1296_v51  ;;  %726 = vmatpush.msra.mxu0 %v1410_v60 }
  0x64   :  { %758 = vmatpush.msra.mxu1 %v1303_v54  ;;  %925 = vmatpush.msrb.mxu0 %v1531_v16 }
  0x66   :  { %760 = vmatpush.msra.mxu1 %v1334_v63 }
  0x68   :  { %762 = vmatpush.msra.mxu1 %v1361_v13 }
  0x6a   :  { %764 = vmatpush.msra.mxu1 %v1366_v26 }
  0x6c   :  { %955 = vmatpush.msrb.mxu1 %v434_v29  ;;  %v1655_v29 = vld [vmem:[#allocation6_spill] sm:$0xff] }
  0xa4   :  { %v77_v46 = vpop.f32.mrf.mxu0 }
  0xa8   :  { %v178_v40 = vpop.f32.mrf.mxu1  ;;  %v271_v0 = vpop.f32.mrf.mxu3 }
  0xa9   :  { %v179_v52 = vadd.f32 %v178_v40, %v77_v46  ;;  %v1656_v40 = vld [vmem:[#allocation7_spill] sm:$0xff] }
  0xaa   :  { %v232_v56 = vpop.f32.mrf.mxu2 }
  0xab   :  { %v233_v58 = vadd.f32 %v232_v56, %v179_v52 }
  0xad   :  { %v272_v6 = vadd.f32 %v271_v0, %v233_v58 }
  0xc0   :  { %v340_v18 = vpop.f32.mrf.mxu0 }
  0xc1   :  { %v341_v30 = vadd.f32 %v340_v18, %v272_v6 }
  0xc8   :  { %v377_v36 = vpop.f32.mrf.mxu1 }
  0xc9   :  { %v378_v47 = vadd.f32 %v377_v36, %v341_v30 }
  0xcb   :  { %v380_v48 = vmul.f32 0.03125, %v378_v47 }
  0xcd   :  { %v383_v53 = vsel %vm381_vm1, %v380_v48, 0 }
  0xce   :  { %v406_v60 = vand.u32 4294901760, %v383_v53 }
  0xd0   :  { %v407_v8 = vsub.f32 %v383_v53, %v406_v60  ;;  %437 = vmatmul.f32.vlgmr.msrb.gmra.mxu3 %v406_v60 }
  0xd1   :  { %529 = vmatpush.msrb.mxu3 %v1531_v16 }
  0xd2   :  { %v408_v55 = vand.u32 4294901760, %v407_v8 }
  0xd4   :  { %v409_v14 = vsub.f32 %v407_v8, %v408_v55 }
  0xd6   :  { %v410_v15 = vand.u32 4294901760, %v409_v14 }
  0xd8   :  { %411 = vmatmul.f32.vlgmr.msrb.gmra.mxu2 %v410_v15  ;;  %485 = vmatmul.f32.vlgmr.msra.gmra.mxu3 %v408_v55 }
  0xd9   :  { %507 = vmatpush.msrb.mxu2 %v1539_v20  ;;  %583 = vmatpush.msra.mxu3 %v1253_v37  ;;  %v1657_v37 = vld [vmem:[#allocation9_spill] sm:$0xff] }
  0xdb   :  { %589 = vmatpush.msra.mxu3 %v1256_v38  ;;  %v1658_v38 = vld [vmem:[#allocation10_spill] sm:$0xff] }
  0xdd   :  { %595 = vmatpush.msra.mxu3 %v1273_v43  ;;  %v1659_v43 = vld [vmem:[#allocation11_spill] sm:$0xff] }
  0xdf   :  { %601 = vmatpush.msra.mxu3 %v1291_v49  ;;  %v1660_v49 = vld [vmem:[#allocation12_spill] sm:$0xff] }
  0xe0   :  { %461 = vmatmul.f32.vlgmr.msra.gmra.mxu2 %v407_v8  ;;  %531 = vmatmul.f32.vlgmr.msrb.gmra.mxu3 %v406_v60 }
  0xe1   :  { %538 = vmatpush.msra.mxu2 %v1156_v3  ;;  %607 = vmatpush.msra.mxu3 %v1654_v21 }
  0xe3   :  { %540 = vmatpush.msra.mxu2 %v1158_v4  ;;  %613 = vmatpush.msra.mxu3 %v1655_v29 }
  0xe5   :  { %542 = vmatpush.msra.mxu2 %v1160_v5  ;;  %619 = vmatpush.msra.mxu3 %v1656_v40 }
  0xe7   :  { %544 = vmatpush.msra.mxu2 %v1171_v9  ;;  %625 = vmatpush.msra.mxu3 %v1657_v37 }
  0xe8   :  { %509 = vmatmul.f32.vlgmr.msrb.gmra.mxu2 %v406_v60 }
  0xe9   :  { %546 = vmatpush.msra.mxu2 %v1173_v10  ;;  %631 = vmatpush.msra.mxu3 %v1658_v38 }
  0xeb   :  { %548 = vmatpush.msra.mxu2 %v1175_v11  ;;  %637 = vmatpush.msra.mxu3 %v1659_v43 }
  0xed   :  { %550 = vmatpush.msra.mxu2 %v1193_v17  ;;  %643 = vmatpush.msra.mxu3 %v1660_v49 }
  0xef   :  { %552 = vmatpush.msra.mxu2 %v1218_v25  ;;  %649 = vmatpush.msra.mxu3 %v1427_v1 }
  0xf1   :  { %554 = vmatpush.msra.mxu2 %v1227_v28  ;;  %655 = vmatpush.msra.mxu3 %v1438_v2 }
  0xf3   :  { %556 = vmatpush.msra.mxu2 %v1247_v35  ;;  %661 = vmatpush.msra.mxu3 %v1446_v59 }
  0xf5   :  { %558 = vmatpush.msra.mxu2 %v1277_v45  ;;  %667 = vmatpush.msra.mxu3 %v1453_v31 }
  0xf7   :  { %560 = vmatpush.msra.mxu2 %v1296_v51  ;;  %673 = vmatpush.msra.mxu3 %v1459_v44 }
  0xf9   :  { %842 = vmatpush.msrb.mxu3 %v1156_v3  ;;  %562 = vmatpush.msra.mxu2 %v1303_v54 }
  0xfb   :  { %844 = vmatpush.msrb.mxu3 %v1158_v4  ;;  %564 = vmatpush.msra.mxu2 %v1334_v63 }
  0xfd   :  { %846 = vmatpush.msrb.mxu3 %v1160_v5  ;;  %566 = vmatpush.msra.mxu2 %v1361_v13 }
  0xff   :  { %848 = vmatpush.msrb.mxu3 %v1171_v9  ;;  %568 = vmatpush.msra.mxu2 %v1366_v26 }
 0x101   :  { %775 = vmatpush.msrb.mxu2 %v1210_v22  ;;  %850 = vmatpush.msrb.mxu3 %v1173_v10 }
 0x103   :  { %779 = vmatpush.msrb.mxu2 %v1213_v23  ;;  %852 = vmatpush.msrb.mxu3 %v1175_v11 }
 0x105   :  { %783 = vmatpush.msrb.mxu2 %v1216_v24  ;;  %854 = vmatpush.msrb.mxu3 %v1193_v17 }
 0x107   :  { %787 = vmatpush.msrb.mxu2 %v1225_v27  ;;  %856 = vmatpush.msrb.mxu3 %v1218_v25  ;;  %v1661_v27 = vld [vmem:[#allocation8_spill] sm:$0xff] }
 0x109   :  { %791 = vmatpush.msrb.mxu2 %v1241_v33  ;;  %858 = vmatpush.msrb.mxu3 %v1227_v28 }
 0x10b   :  { %795 = vmatpush.msrb.mxu2 %v1245_v34  ;;  %860 = vmatpush.msrb.mxu3 %v1247_v35 }
 0x10d   :  { %799 = vmatpush.msrb.mxu2 %v1265_v41  ;;  %862 = vmatpush.msrb.mxu3 %v1277_v45 }
 0x10f   :  { %803 = vmatpush.msrb.mxu2 %v1294_v50  ;;  %864 = vmatpush.msrb.mxu3 %v1296_v51 }
 0x111   :  { %807 = vmatpush.msrb.mxu2 %v1315_v57  ;;  %866 = vmatpush.msrb.mxu3 %v1303_v54 }
 0x113   :  { %811 = vmatpush.msrb.mxu2 %v1332_v62  ;;  %868 = vmatpush.msrb.mxu3 %v1334_v63 }
 0x115   :  { %815 = vmatpush.msrb.mxu2 %v1359_v12  ;;  %870 = vmatpush.msrb.mxu3 %v1361_v13 }
 0x117   :  { %819 = vmatpush.msrb.mxu2 %v1377_v32  ;;  %872 = vmatpush.msrb.mxu3 %v1366_v26 }
 0x119   :  { %823 = vmatpush.msrb.mxu2 %v1383_v39 }
 0x11b   :  { %827 = vmatpush.msrb.mxu2 %v1407_v61 }
 0x11d   :  { %831 = vmatpush.msrb.mxu2 %v1421_v7 }
 0x11f   :  { %835 = vmatpush.msrb.mxu2 %v1432_v42 }
 0x153   :  { %v438_v3 = vpop.f32.mrf.mxu3 }
 0x15b   :  { %v412_v4 = vpop.f32.mrf.mxu2  ;;  %v486_v5 = vpop.f32.mrf.mxu3 }
 0x15c   :  { %v439_v10 = vadd.f32 %v438_v3, %v412_v4 }
 0x163   :  { %v462_v9 = vpop.f32.mrf.mxu2  ;;  %v532_v24 = vpop.f32.mrf.mxu3 }
 0x164   :  { %v463_v11 = vadd.f32 %v462_v9, %v439_v10 }
 0x166   :  { %v487_v17 = vadd.f32 %v486_v5, %v463_v11 }
 0x16b   :  { %v510_v22 = vpop.f32.mrf.mxu2 }
 0x16c   :  { %v511_v23 = vadd.f32 %v510_v22, %v487_v17  ;;  %v1085_v22 = vld [vmem:[%s1634_s2] ss:$0 sm:$0xff] }
 0x16e   :  { %v533_v25 = vadd.f32 %v532_v24, %v511_v23 }
 0x170   :  { %v1613_v28 = vsub.f32 %v1661_v27, %v533_v25 }
 0x172   :  { %v536_v33 = vmul.f32 %v1613_v28, %v1613_v28 }
 0x174   :  { %v569_v34 = vand.u32 4294901760, %v536_v33 }
 0x176   :  { %675 = vmatmul.f32.vlgmr.msra.gmra.mxu3 %v569_v34  ;;  %v570_v35 = vsub.f32 %v536_v33, %v569_v34 }
 0x178   :  { %729 = vmatmul.f32.vlgmr.msra.gmra.mxu0 %v570_v35  ;;  %v571_v41 = vand.u32 4294901760, %v570_v35 }
 0x179   :  { %978 = vmatpush.msra.mxu0 %v1534_v19 }
 0x17a   :  { %768 = vmatmul.f32.vlgmr.msra.gmra.mxu1 %v571_v41  ;;  %v572_v45 = vsub.f32 %v570_v35, %v571_v41 }
 0x17b   :  { %1001 = vmatpush.msra.mxu1 %v1531_v16 }
 0x17c   :  { %v573_v50 = vand.u32 4294901760, %v572_v45 }
 0x17e   :  { %574 = vmatmul.f32.vlgmr.msra.gmra.mxu2 %v573_v50  ;;  %874 = vmatmul.f32.vlgmr.msrb.gmra.mxu3 %v569_v34 }
 0x186   :  { %837 = vmatmul.f32.vlgmr.msrb.gmra.mxu2 %v569_v34 }
 0x1f5   :  { %v730_v59 = vpop.f32.mrf.mxu0 }
 0x1f7   :  { %v769_v63 = vpop.f32.mrf.mxu1 }
 0x1f9   :  { %v676_v51 = vpop.f32.mrf.mxu3 }
 0x201   :  { %v575_v54 = vpop.f32.mrf.mxu2  ;;  %v875_v13 = vpop.f32.mrf.mxu3 }
 0x202   :  { %v677_v57 = vadd.f32 %v676_v51, %v575_v54 }
 0x204   :  { %v731_v62 = vadd.f32 %v730_v59, %v677_v57 }
 0x206   :  { %v770_v2 = vadd.f32 %v769_v63, %v731_v62 }
 0x209   :  { %v838_v7 = vpop.f32.mrf.mxu2 }
 0x20a   :  { %v839_v12 = vadd.f32 %v838_v7, %v770_v2 }
 0x20c   :  { %v876_v26 = vadd.f32 %v875_v13, %v839_v12 }
 0x20e   :  { %v878_v32 = vmul.f32 0.032258064, %v876_v26 }
 0x210   :  { %1086 = vrsqrt.f32 %v878_v32  ;;  %vm886_vm2 = vcmp.eq.f32.partialorder %v878_v32, inf  ;;  %v889_v46 = vand.u32 2147483648, %v878_v32  ;;  %vm888_vm3 = vcmp.eq.f32.partialorder %v878_v32, 0.0 }
 0x216   :  { %v1087_v39 = vpop.eup %1086 }
 0x217   :  { %v880_v42 = vmul.f32 %v1087_v39, %v878_v32 }
 0x219   :  { %v881_v61 = vmul.f32 %v1087_v39, %v880_v42 }
 0x21b   :  { %v882_v1 = vmul.f32 0.5, %v881_v61 }
 0x21d   :  { %v883_v31 = vsub.f32 1.5, %v882_v1 }
 0x21f   :  { %v884_v44 = vmul.f32 %v1087_v39, %v883_v31 }
 0x221   :  { %v885_v19 = vmul.f32 %v884_v44, %v878_v32 }
 0x223   :  { %v887_v52 = vsel %vm886_vm2, %v878_v32, %v885_v19 }
 0x224   :  { %v890_v56 = vsel %vm888_vm3, %v889_v46, %v887_v52 }
 0x225   :  { %v891_v58 = vadd.f32 1e-06, %v890_v56 }
 0x227   :  { %1088 = vrcp.f32 %v891_v58  ;;  %v903_v30 = vand.u32 2147483648, %v891_v58  ;;  %v901_v47 = vand.u32 2147483647, %v891_v58  ;;  %vm897_vm5 = vweird.f32 %v891_v58 }
 0x229   :  { %v904_v53 = vor.u32 1.1754944e-38, %v903_v30  ;;  %vm902_vm7 = vcmp.eq.f32.partialorder %v901_v47, 8.507059e+37 }
 0x22d   :  { %v1089_v0 = vpop.eup %1088 }
 0x22e   :  { %v893_v6 = vmul.f32 %v1089_v0, %v891_v58  ;;  %vm898_vm4 = vweird.f32 %v1089_v0 }
 0x22f   :  { %vm899_vm6 = vmor %vm897_vm5, %vm898_vm4 }
 0x230   :  { %v894_v18 = vsub.f32 1.0, %v893_v6 }
 0x232   :  { %v895_v36 = vmul.f32 %v1089_v0, %v894_v18 }
 0x234   :  { %v896_v48 = vadd.f32 %v1089_v0, %v895_v36 }
 0x236   :  { %v900_v60 = vsel %vm899_vm6, %v1089_v0, %v896_v48 }
 0x237   :  { %v905_v8 = vsel %vm902_vm7, %v904_v53, %v900_v60 }
 0x238   :  { %v907_v55 = vsel %vm381_vm1, %v905_v8, 0 }
 0x239   :  { %v926_v14 = vand.u32 4294901760, %v907_v55 }
 0x23b   :  { %v927_v15 = vsub.f32 %v907_v55, %v926_v14  ;;  %957 = vmatmul.f32.vlgmr.msrb.gmra.mxu1 %v926_v14 }
 0x23c   :  { %1049 = vmatpush.msrb.mxu1 %v1531_v16  ;;  %v1084_v16 = vld [vmem:[%s1633_s1] ss:$0 sm:$0xff] }
 0x23d   :  { %v928_v21 = vand.u32 4294901760, %v927_v15 }
 0x23f   :  { %v929_v29 = vsub.f32 %v927_v15, %v928_v21 }
 0x241   :  { %v930_v40 = vand.u32 4294901760, %v929_v29 }
 0x243   :  { %931 = vmatmul.f32.vlgmr.msrb.gmra.mxu0 %v930_v40  ;;  %1005 = vmatmul.f32.vlgmr.msra.gmra.mxu1 %v928_v21 }
 0x244   :  { %1027 = vmatpush.msrb.mxu0 %v1539_v20  ;;  %v1060_v20 = vmul.f32 %v1084_v16, %v1613_v28 }
 0x24b   :  { %981 = vmatmul.f32.vlgmr.msra.gmra.mxu0 %v927_v15  ;;  %1051 = vmatmul.f32.vlgmr.msrb.gmra.mxu1 %v926_v14 }
 0x253   :  { %1029 = vmatmul.f32.vlgmr.msrb.gmra.mxu0 %v926_v14 }
 0x2b8   :  { %v958_v37 = vpop.f32.mrf.mxu1 }
 0x2c0   :  { %v932_v38 = vpop.f32.mrf.mxu0  ;;  %v1006_v43 = vpop.f32.mrf.mxu1 }
 0x2c1   :  { %v959_v3 = vadd.f32 %v958_v37, %v932_v38 }
 0x2c8   :  { %v982_v49 = vpop.f32.mrf.mxu0  ;;  %v1052_v11 = vpop.f32.mrf.mxu1 }
 0x2c9   :  { %v983_v4 = vadd.f32 %v982_v49, %v959_v3 }
 0x2cb   :  { %v1007_v5 = vadd.f32 %v1006_v43, %v983_v4 }
 0x2d0   :  { %v1030_v9 = vpop.f32.mrf.mxu0 }
 0x2d1   :  { %v1031_v10 = vadd.f32 %v1030_v9, %v1007_v5 }
 0x2d3   :  { %v1053_v17 = vadd.f32 %v1052_v11, %v1031_v10 }
 0x2d5   :  { %v1061_v23 = vmul.f32 %v1060_v20, %v1053_v17 }
 0x2d7   :  { %v1065_v24 = vadd.f32 %v1085_v22, %v1061_v23 }
 0x2d9   :  { %1066 = vst [vmem:[#allocation2] sm:$0xf] %v1065_v24 }
 0x2da   :  { %1077 = dma.vmem_to_hbm [thread:$0]  %s1073_s6, 64, %s1075_s9, [#allocation3]  }
 0x2db   :  { %1114 = dma.done.wait [#allocation3], 64  }
 0x2dc   :  { %1115 = vsyncadd [#allocation3], 4294967232 }
 0x2dd   :  { %1082 = vsyncpa [#allocation3], 1 }

// kernel: tpu_custom_call.1
= control target key start
LH: loop header
LB: loop body
LE: loop exit
PB: predicated region body
PF: predicated region fallthrough
CT: control target
= control target key end

     0   :  { %8 = vsyncpa [#allocation3], 0  ;;  %s316_s0 = inlined_call_operand.hbm [shape: f32[16,32], index: 0, kind: input, shape index: {}]   ;;  %s317_s1 = inlined_call_operand.hbm [shape: f32[1,32], index: 1, kind: input, shape index: {}]   ;;  %s318_s2 = inlined_call_operand.vmem [shape: f32[1,32], index: 2, kind: input, shape index: {}]   ;;  %s319_s3 = inlined_call_operand.hbm [shape: f32[16,32], index: 3, kind: output, shape index: {}]  }
   0x1   :  { %9 = vsyncpa [#allocation6], 0 }
   0x2   :  { %10 = vsyncpa [#allocation4], 0  ;;  %s15_s14 = sshll.u32 %s316_s0, 4  ;;  %s261_s15 = smov [#allocation2]   ;;  %s16_s14 = int_to_ptr.hbm [resolvable:$true] %s15_s14 }
   0x3   :  { %s17_s16 = sshll.u32 %s261_s15, 4  ;;  %s29_s19 = sshll.u32 %s317_s1, 4  ;;  %s18_s16 = int_to_ptr.vmem [resolvable:$true] %s17_s16  ;;  %s30_s19 = int_to_ptr.hbm [resolvable:$true] %s29_s19 }
   0x4   :  { %s262_s20 = smov 128   ;;  %s263_s21 = smov 8  }
   0x5   :  { %23 = dma.hbm_to_vmem [thread:$0]  %s16_s14, 256, %s18_s16, [#allocation3], %s262_s20, %s262_s20, %s263_s21  }
   0x6   :  { %s264_s22 = smov [#allocation5]  }
   0x7   :  { %s31_s23 = sshll.u32 %s264_s22, 4  ;;  %s32_s23 = int_to_ptr.vmem [resolvable:$true] %s31_s23 }
   0x8   :  { %34 = dma.hbm_to_vmem [thread:$0]  %s30_s19, 16, %s32_s23, [#allocation6]  }
   0x9   :  { %255 = dma.done.wait [#allocation3], 256  }
   0xa   :  { %256 = vsyncadd [#allocation3], 4294967040 }
   0xb   :  { %257 = dma.done.wait [#allocation6], 16  }
   0xc   :  { %258 = vsyncadd [#allocation6], 4294967280  ;;  %vm47_vm0 = vcmask 261120   ;;  %v45_v0 = vld [vmem:[#allocation2] sm:$0xff]  ;;  %v46_v2 = vld [vmem:[#allocation2 + $0x8] sm:$0xff]  ;;  %v265_v4 = vmov 32.0  }
   0xd   :  { %v48_v1 = vsel %vm47_vm0, %v45_v0, 0.0  ;;  %v51_v3 = vsel %vm47_vm0, %v46_v2, 0.0  ;;  %173 = vrcp.f32 %v265_v4  ;;  %v171_v51 = vld [vmem:[#allocation5] ss:$0 sm:$0xff]  ;;  %v172_v60 = vld [vmem:[%s318_s2] ss:$0 sm:$0xff] }
   0xe   :  { %49 = vadd.xlane.f32.xlu0 %v48_v1  ;;  %s266_s2 = smov [#allocation7]   ;;  %s151_s27 = sshll.u32 %s319_s3, 4  ;;  %s152_s27 = int_to_ptr.hbm [resolvable:$true] %s151_s27 }
   0xf   :  { %s149_s24 = sshll.u32 %s266_s2, 4  ;;  %s150_s24 = int_to_ptr.vmem [resolvable:$true] %s149_s24 }
  0x13   :  { %v174_v5 = vpop.eup %173 }
  0x14   :  { %v55_v6 = vmul.f32 32.0, %v174_v5  ;;  %vm59_vm1 = vweird.f32 %v174_v5 }
  0x16   :  { %52 = vadd.xlane.f32.xlu0 %v51_v3  ;;  %v56_v7 = vsub.f32 1.0, %v55_v6 }
  0x18   :  { %v57_v8 = vmul.f32 %v174_v5, %v56_v7 }
  0x1a   :  { %v58_v9 = vadd.f32 %v174_v5, %v57_v8 }
  0x1c   :  { %v60_v10 = vsel %vm59_vm1, %v174_v5, %v58_v9 }
  0x81   :  { %v50_v11 = vpop.xlane.xlu0 %49 }
  0x82   :  { %v61_v12 = vmul.f32 %v60_v10, %v50_v11 }
  0x84   :  { %v63_v13 = vsub.f32 %v45_v0, %v61_v12 }
  0x86   :  { %v65_v14 = vmul.f32 %v63_v13, %v63_v13  ;;  %v134_v57 = vmul.f32 %v171_v51, %v63_v13 }
  0x88   :  { %v67_v15 = vsel %vm47_vm0, %v65_v14, 0.0 }
  0x89   :  { %68 = vadd.xlane.f32.xlu1 %v67_v15  ;;  %v53_v16 = vpop.xlane.xlu0 %52 }
  0x8a   :  { %v62_v17 = vmul.f32 %v60_v10, %v53_v16 }
  0x8c   :  { %v299_v18 = vsub.f32 %v46_v2, %v62_v17 }
  0x8e   :  { %v66_v19 = vmul.f32 %v299_v18, %v299_v18  ;;  %v135_v6 = vmul.f32 %v171_v51, %v299_v18 }
  0x90   :  { %v70_v20 = vsel %vm47_vm0, %v66_v19, 0.0 }
  0x91   :  { %71 = vadd.xlane.f32.xlu1 %v70_v20 }
  0xfc   :  { %v69_v21 = vpop.xlane.xlu1 %68 }
  0xfd   :  { %v73_v22 = vmul.f32 0.032258064, %v69_v21 }
  0xff   :  { %175 = vrsqrt.f32 %v73_v22  ;;  %vm82_vm2 = vcmp.eq.f32.partialorder %v73_v22, inf  ;;  %v85_v35 = vand.u32 2147483648, %v73_v22  ;;  %vm84_vm3 = vcmp.eq.f32.partialorder %v73_v22, 0.0 }
 0x104   :  { %v72_v23 = vpop.xlane.xlu1 %71 }
 0x105   :  { %v176_v24 = vpop.eup %175  ;;  %v74_v25 = vmul.f32 0.032258064, %v72_v23 }
 0x106   :  { %v76_v26 = vmul.f32 %v176_v24, %v73_v22 }
 0x107   :  { %177 = vrsqrt.f32 %v74_v25  ;;  %vm94_vm4 = vcmp.eq.f32.partialorder %v74_v25, inf  ;;  %v97_v43 = vand.u32 2147483648, %v74_v25  ;;  %vm96_vm5 = vcmp.eq.f32.partialorder %v74_v25, 0.0 }
 0x108   :  { %v77_v27 = vmul.f32 %v176_v24, %v76_v26 }
 0x10a   :  { %v78_v28 = vmul.f32 0.5, %v77_v27 }
 0x10c   :  { %v79_v29 = vsub.f32 1.5, %v78_v28 }
 0x10d   :  { %v178_v30 = vpop.eup %177 }
 0x10e   :  { %v80_v31 = vmul.f32 %v176_v24, %v79_v29  ;;  %v88_v32 = vmul.f32 %v178_v30, %v74_v25 }
 0x110   :  { %v81_v33 = vmul.f32 %v80_v31, %v73_v22  ;;  %v89_v34 = vmul.f32 %v178_v30, %v88_v32 }
 0x112   :  { %v83_v36 = vsel %vm82_vm2, %v73_v22, %v81_v33  ;;  %v90_v37 = vmul.f32 0.5, %v89_v34 }
 0x113   :  { %v86_v38 = vsel %vm84_vm3, %v85_v35, %v83_v36 }
 0x114   :  { %v99_v39 = vadd.f32 1e-06, %v86_v38  ;;  %v91_v40 = vsub.f32 1.5, %v90_v37 }
 0x116   :  { %179 = vrcp.f32 %v99_v39  ;;  %v92_v41 = vmul.f32 %v178_v30, %v91_v40  ;;  %v112_v50 = vand.u32 2147483648, %v99_v39  ;;  %v110_v53 = vand.u32 2147483647, %v99_v39 }
 0x117   :  { %vm106_vm7 = vweird.f32 %v99_v39 }
 0x118   :  { %v93_v42 = vmul.f32 %v92_v41, %v74_v25  ;;  %v113_v56 = vor.u32 1.1754944e-38, %v112_v50  ;;  %vm111_vm9 = vcmp.eq.f32.partialorder %v110_v53, 8.507059e+37 }
 0x11a   :  { %v95_v44 = vsel %vm94_vm4, %v74_v25, %v93_v42 }
 0x11b   :  { %v98_v45 = vsel %vm96_vm5, %v97_v43, %v95_v44 }
 0x11c   :  { %v180_v46 = vpop.eup %179  ;;  %v100_v47 = vadd.f32 1e-06, %v98_v45 }
 0x11d   :  { %v102_v48 = vmul.f32 %v180_v46, %v99_v39  ;;  %vm107_vm6 = vweird.f32 %v180_v46 }
 0x11e   :  { %181 = vrcp.f32 %v100_v47  ;;  %vm108_vm8 = vmor %vm106_vm7, %vm107_vm6  ;;  %v126_v0 = vand.u32 2147483648, %v100_v47  ;;  %v124_v2 = vand.u32 2147483647, %v100_v47  ;;  %vm120_vm11 = vweird.f32 %v100_v47 }
 0x11f   :  { %v103_v49 = vsub.f32 1.0, %v102_v48 }
 0x120   :  { %v127_v5 = vor.u32 1.1754944e-38, %v126_v0  ;;  %vm125_vm13 = vcmp.eq.f32.partialorder %v124_v2, 8.507059e+37 }
 0x121   :  { %v104_v52 = vmul.f32 %v180_v46, %v103_v49 }
 0x123   :  { %v105_v54 = vadd.f32 %v180_v46, %v104_v52 }
 0x124   :  { %v182_v55 = vpop.eup %181 }
 0x125   :  { %v109_v58 = vsel %vm108_vm8, %v180_v46, %v105_v54  ;;  %v116_v59 = vmul.f32 %v182_v55, %v100_v47  ;;  %vm121_vm10 = vweird.f32 %v182_v55 }
 0x126   :  { %v114_v61 = vsel %vm111_vm9, %v113_v56, %v109_v58  ;;  %vm122_vm12 = vmor %vm120_vm11, %vm121_vm10 }
 0x127   :  { %v117_v62 = vsub.f32 1.0, %v116_v59  ;;  %v136_v63 = vmul.f32 %v134_v57, %v114_v61 }
 0x129   :  { %v118_v1 = vmul.f32 %v182_v55, %v117_v62  ;;  %v141_v3 = vadd.f32 %v172_v60, %v136_v63 }
 0x12b   :  { %v119_v4 = vadd.f32 %v182_v55, %v118_v1  ;;  %143 = vst.msk [vmem:[#allocation7] sm:$0xff] %vm47_vm0, %v141_v3 }
 0x12d   :  { %v123_v7 = vsel %vm122_vm12, %v182_v55, %v119_v4 }
 0x12e   :  { %v128_v8 = vsel %vm125_vm13, %v127_v5, %v123_v7 }
 0x12f   :  { %v137_v9 = vmul.f32 %v135_v6, %v128_v8 }
 0x131   :  { %v142_v10 = vadd.f32 %v172_v60, %v137_v9 }
 0x133   :  { %144 = vst.msk [vmem:[#allocation7 + $0x8] sm:$0xff] %vm47_vm0, %v142_v10 }
 0x134   :  { %157 = dma.vmem_to_hbm [thread:$0]  %s150_s24, 256, %s152_s27, [#allocation4], %s262_s20, %s262_s20, %s263_s21  }
 0x135   :  { %259 = dma.done.wait [#allocation4], 256  }
 0x136   :  { %260 = vsyncadd [#allocation4], 4294967040 }
 0x137   :  { %162 = vsyncpa [#allocation3], 1 }
 0x138   :  { %163 = vsyncpa [#allocation6], 1 }
 0x139   :  { %164 = vsyncpa [#allocation4], 1 }

</bundles_post_ra>
